<compile_context>
chip_gen: v6e
topology: v6e:2x2x1
jax: 0.10.0
libtpu: 0.0.40
codegen_flags: <defaults>
</compile_context>

<pallas_src>
import functools

import jax
import jax.numpy as jnp
from jax.experimental import pallas as pl
from jax.experimental.pallas import tpu as pltpu

LANE = 128


def mlp_kernel(x_ref, w1_ref, b1_ref, w2_ref, b2_ref, w3_ref, b3_ref, o_ref):
    # relu(relu(x @ W1 + b1) @ W2 + b2) @ W3 + b3
    # x arrives f32 (no extra wrapper HBM pass); cast to bf16 here for the MXU.
    # Accumulation, bias-add and ReLU stay f32 (v5e has no bf16 VPU path);
    # activations drop to bf16 only right before the next MXU matmul.
    x = x_ref[...].astype(jnp.bfloat16)
    h1 = jnp.dot(x, w1_ref[...], preferred_element_type=jnp.float32) + b1_ref[...]
    h1 = jnp.maximum(h1, 0.0).astype(jnp.bfloat16)
    h2 = jnp.dot(h1, w2_ref[...], preferred_element_type=jnp.float32) + b2_ref[...]
    h2 = jnp.maximum(h2, 0.0).astype(jnp.bfloat16)
    out = jnp.dot(h2, w3_ref[...], preferred_element_type=jnp.float32) + b3_ref[...]
    o_ref[...] = out.astype(o_ref.dtype)


def prepare_params(w1, b1, w2, b2, w3, b3):
    """One-time parameter prep (keep OUT of the per-call hot path).

    Casts weights to bf16 (native MXU dtype), biases to f32, and pads the
    class dim of W3/b3 to a lane-dense multiple of 128 so the kernel's final
    store is an unmasked full-width vst.
    """
    num_classes = w3.shape[1]
    cp = pl.cdiv(num_classes, LANE) * LANE
    if cp != num_classes:
        w3 = jnp.pad(w3, ((0, 0), (0, cp - num_classes)))
        b3 = jnp.pad(b3, ((0, 0), (0, cp - num_classes)))
    return (
        w1.astype(jnp.bfloat16), b1.astype(jnp.float32),
        w2.astype(jnp.bfloat16), b2.astype(jnp.float32),
        w3.astype(jnp.bfloat16), b3.astype(jnp.float32),
        num_classes,
    )


def _pick_tile_b(B: int) -> int:
    """Batch tile: 16/128-aligned (bf16 sublane packing), big enough to feed
    the MXU, and >=2 grid steps when the batch allows it so both v7x
    TensorCores get work (free on v5e/v6e)."""
    if B <= 256:
        return B          # single grid step; block == full batch dim
    if B < 1024:
        return 256
    return 512


def _vmem_cap_bytes() -> int:
    """Generation-aware VMEM ceiling with ~20% headroom for Mosaic internal
    scratch: ~51 MiB on v7x (64 MiB physical), ~102 MiB on v5e/v6e (128 MiB)."""
    try:
        physical = int(pltpu.get_tpu_info().vmem_capacity_bytes)
    except Exception:
        physical = 64 * 2**20
    return int(physical * 0.8)


@functools.partial(
    jax.jit,
    static_argnames=("num_classes", "tile_b", "single_buffer_weights"),
)
def _forward_impl(x, w1, b1, w2, b2, w3, b3, *, num_classes, tile_b,
                  single_buffer_weights):
    B, I = x.shape
    H = w1.shape[1]
    Cp = w3.shape[1]          # already lane-padded by prepare_params

    # Pallas masks the partial last tile's output writes, so no wrapper pad of x.
    n_steps = pl.cdiv(B, tile_b)

    def const2(i):
        return (0, 0)

    def weight_spec(shape):
        if single_buffer_weights:
            # Resident operands (constant block index): double-buffering them
            # is pure VMEM waste, request a single buffer.
            return pl.BlockSpec(shape, const2, pipeline_mode=pl.Buffered(1))
        return pl.BlockSpec(shape, const2)

    # VMEM budget: weights/biases (x buffer count), double-buffered f32 x/out
    # tiles, plus in-kernel intermediates; 2x safety factor, generation cap.
    wbuf = 1 if single_buffer_weights else 2
    est = (
        wbuf * (2 * (I * H + H * H + H * Cp) + 4 * (2 * H + Cp))
        + 2 * 4 * tile_b * I
        + 2 * 4 * tile_b * Cp
        + tile_b * (2 * I + 12 * H + 4 * Cp)
    )
    vmem_limit = int(min(max(2 * est, 16 * 2**20), _vmem_cap_bytes()))

    flops = 2 * B * (I * H + H * H + H * Cp)
    bytes_accessed = (
        4 * B * I                              # x (f32)
        + 2 * (I * H + H * H + H * Cp)         # bf16 weights
        + 4 * (2 * H + Cp)                     # f32 biases
        + 4 * B * Cp                           # f32 output
    )

    out_padded = pl.pallas_call(
        mlp_kernel,
        out_shape=jax.ShapeDtypeStruct((B, Cp), jnp.float32),
        grid=(n_steps,),
        in_specs=[
            pl.BlockSpec((tile_b, I), lambda i: (i, 0)),   # x tile (streamed)
            weight_spec((I, H)),                           # W1 (resident)
            weight_spec((1, H)),                           # b1
            weight_spec((H, H)),                           # W2 (resident)
            weight_spec((1, H)),                           # b2
            weight_spec((H, Cp)),                          # W3 (resident, lane-padded)
            weight_spec((1, Cp)),                          # b3
        ],
        out_specs=pl.BlockSpec((tile_b, Cp), lambda i: (i, 0)),
        compiler_params=pltpu.CompilerParams(
            dimension_semantics=("parallel",),
            vmem_limit_bytes=vmem_limit,
        ),
        cost_estimate=pl.CostEstimate(
            flops=flops, bytes_accessed=bytes_accessed, transcendentals=0,
        ),
    )(x, w1, b1, w2, b2, w3, b3)

    return out_padded[:, :num_classes]


_SINGLE_BUFFER_WEIGHTS = None  # resolved lazily on the first call


def neural_net_forward(x, params, *, tile_b=None):
    """x: (batch, input_size) f32; params: output of prepare_params."""
    global _SINGLE_BUFFER_WEIGHTS
    w1, b1, w2, b2, w3, b3, num_classes = params
    if tile_b is None:
        tile_b = _pick_tile_b(x.shape[0])

    if _SINGLE_BUFFER_WEIGHTS is None:
        try:
            out = _forward_impl(
                x, w1, b1, w2, b2, w3, b3,
                num_classes=num_classes, tile_b=tile_b,
                single_buffer_weights=True)
            _SINGLE_BUFFER_WEIGHTS = True
            return out
        except Exception:
            # This jax version rejects pl.Buffered(1) on resident inputs; fall
            # back to default double-buffering (costs VMEM, not correctness).
            _SINGLE_BUFFER_WEIGHTS = False

    return _forward_impl(
        x, w1, b1, w2, b2, w3, b3,
        num_classes=num_classes, tile_b=tile_b,
        single_buffer_weights=_SINGLE_BUFFER_WEIGHTS)


def reference_forward(x, w1, b1, w2, b2, w3, b3):
    h1 = jnp.maximum(x @ w1 + b1, 0.0)
    h2 = jnp.maximum(h1 @ w2 + b2, 0.0)
    return h2 @ w3 + b3


if __name__ == "__main__":
    # Small shapes implied by the module: (batch, input_size) -> (batch, num_classes)
    batch, input_size, hidden_size, num_classes = 16, 32, 32, 16

    key = jax.random.PRNGKey(0)
    kx, k1, kb1, k2, kb2, k3, kb3 = jax.random.split(key, 7)

    x = jax.random.normal(kx, (batch, input_size), dtype=jnp.float32)

    # Deterministic parameter init (uniform, roughly matching nn.Linear scale).
    def init_w(k, fan_in, fan_out):
        bound = 1.0 / jnp.sqrt(fan_in)
        return jax.random.uniform(k, (fan_in, fan_out), jnp.float32, -bound, bound)

    def init_b(k, fan_in, fan_out):
        bound = 1.0 / jnp.sqrt(fan_in)
        return jax.random.uniform(k, (1, fan_out), jnp.float32, -bound, bound)

    w1 = init_w(k1, input_size, hidden_size)
    b1 = init_b(kb1, input_size, hidden_size)
    w2 = init_w(k2, hidden_size, hidden_size)
    b2 = init_b(kb2, hidden_size, hidden_size)
    w3 = init_w(k3, hidden_size, num_classes)
    b3 = init_b(kb3, hidden_size, num_classes)

    # One-time prep (bf16 weights, lane-padded class dim) — NOT per forward.
    params = prepare_params(w1, b1, w2, b2, w3, b3)

    out = neural_net_forward(x, params)
    out = jax.block_until_ready(out)

    ref = reference_forward(x, w1, b1, w2, b2, w3, b3)
    assert out.shape == (batch, num_classes)
    # Matmul inputs are bf16 (f32 accumulation) -> loose-ish tolerance.
    assert jnp.allclose(out, ref, atol=1e-1, rtol=5e-2), (
        float(jnp.max(jnp.abs(out - ref)))
    )

    print("KERNEL_OK")
</pallas_src>

<mosaic_0001>
module attributes {stable_mosaic.version = 11 : i64} {
  func.func @mlp_kernel(%arg0: i32, %arg1: memref<16x32xf32, #tpu.memory_space<vmem>>, %arg2: memref<32x32xbf16, #tpu.memory_space<vmem>>, %arg3: memref<1x32xf32, #tpu.memory_space<vmem>>, %arg4: memref<32x32xbf16, #tpu.memory_space<vmem>>, %arg5: memref<1x32xf32, #tpu.memory_space<vmem>>, %arg6: memref<32x128xbf16, #tpu.memory_space<vmem>>, %arg7: memref<1x128xf32, #tpu.memory_space<vmem>>, %arg8: memref<16x128xf32, #tpu.memory_space<vmem>>) attributes {dimension_semantics = [#tpu.dimension_semantics<parallel>], iteration_bounds = array<i64: 1>, scalar_prefetch = 0 : i64, scratch_operands = 0 : i64, tpu.core_type = #tpu.core_type<tc>, window_params = [{transform_indices = @transform_0, window_bounds = array<i64: 16, 32>}, {pipeline_mode = #tpu.pipeline_mode<synchronous>, transform_indices = @transform_1, window_bounds = array<i64: 32, 32>}, {pipeline_mode = #tpu.pipeline_mode<synchronous>, transform_indices = @transform_2, window_bounds = array<i64: 1, 32>}, {pipeline_mode = #tpu.pipeline_mode<synchronous>, transform_indices = @transform_3, window_bounds = array<i64: 32, 32>}, {pipeline_mode = #tpu.pipeline_mode<synchronous>, transform_indices = @transform_4, window_bounds = array<i64: 1, 32>}, {pipeline_mode = #tpu.pipeline_mode<synchronous>, transform_indices = @transform_5, window_bounds = array<i64: 32, 128>}, {pipeline_mode = #tpu.pipeline_mode<synchronous>, transform_indices = @transform_6, window_bounds = array<i64: 1, 128>}, {transform_indices = @transform_7, window_bounds = array<i64: 16, 128>}]} {
    %c0 = arith.constant 0 : index
    %c0_0 = arith.constant 0 : index
    %0 = vector.load %arg1[%c0, %c0_0] : memref<16x32xf32, #tpu.memory_space<vmem>>, vector<16x32xf32>
    %1 = arith.truncf %0 : vector<16x32xf32> to vector<16x32xbf16>
    %c0_1 = arith.constant 0 : index
    %c0_2 = arith.constant 0 : index
    %2 = vector.load %arg2[%c0_1, %c0_2] : memref<32x32xbf16, #tpu.memory_space<vmem>>, vector<32x32xbf16>
    %cst = arith.constant dense<0.000000e+00> : vector<16x32xf32>
    %3 = tpu.matmul %1, %2, %cst {dimension_numbers = #tpu.dot_dimension_numbers<[1], [0], [0], [1], [0, 0, 1, 1], [], []>} : vector<16x32xbf16>, vector<32x32xbf16>, vector<16x32xf32> -> vector<16x32xf32>
    %c0_3 = arith.constant 0 : index
    %c0_4 = arith.constant 0 : index
    %4 = vector.load %arg3[%c0_3, %c0_4] : memref<1x32xf32, #tpu.memory_space<vmem>>, vector<1x32xf32>
    %5 = vector.broadcast %4 : vector<1x32xf32> to vector<16x32xf32>
    %6 = arith.addf %3, %5 : vector<16x32xf32>
    %cst_5 = arith.constant 0.000000e+00 : f32
    %7 = vector.broadcast %cst_5 : f32 to vector<16x32xf32>
    %8 = arith.maximumf %6, %7 : vector<16x32xf32>
    %9 = arith.truncf %8 : vector<16x32xf32> to vector<16x32xbf16>
    %c0_6 = arith.constant 0 : index
    %c0_7 = arith.constant 0 : index
    %10 = vector.load %arg4[%c0_6, %c0_7] : memref<32x32xbf16, #tpu.memory_space<vmem>>, vector<32x32xbf16>
    %cst_8 = arith.constant dense<0.000000e+00> : vector<16x32xf32>
    %11 = tpu.matmul %9, %10, %cst_8 {dimension_numbers = #tpu.dot_dimension_numbers<[1], [0], [0], [1], [0, 0, 1, 1], [], []>} : vector<16x32xbf16>, vector<32x32xbf16>, vector<16x32xf32> -> vector<16x32xf32>
    %c0_9 = arith.constant 0 : index
    %c0_10 = arith.constant 0 : index
    %12 = vector.load %arg5[%c0_9, %c0_10] : memref<1x32xf32, #tpu.memory_space<vmem>>, vector<1x32xf32>
    %13 = vector.broadcast %12 : vector<1x32xf32> to vector<16x32xf32>
    %14 = arith.addf %11, %13 : vector<16x32xf32>
    %cst_11 = arith.constant 0.000000e+00 : f32
    %15 = vector.broadcast %cst_11 : f32 to vector<16x32xf32>
    %16 = arith.maximumf %14, %15 : vector<16x32xf32>
    %17 = arith.truncf %16 : vector<16x32xf32> to vector<16x32xbf16>
    %c0_12 = arith.constant 0 : index
    %c0_13 = arith.constant 0 : index
    %18 = vector.load %arg6[%c0_12, %c0_13] : memref<32x128xbf16, #tpu.memory_space<vmem>>, vector<32x128xbf16>
    %cst_14 = arith.constant dense<0.000000e+00> : vector<16x128xf32>
    %19 = tpu.matmul %17, %18, %cst_14 {dimension_numbers = #tpu.dot_dimension_numbers<[1], [0], [0], [1], [0, 0, 1, 1], [], []>} : vector<16x32xbf16>, vector<32x128xbf16>, vector<16x128xf32> -> vector<16x128xf32>
    %c0_15 = arith.constant 0 : index
    %c0_16 = arith.constant 0 : index
    %20 = vector.load %arg7[%c0_15, %c0_16] : memref<1x128xf32, #tpu.memory_space<vmem>>, vector<1x128xf32>
    %21 = vector.broadcast %20 : vector<1x128xf32> to vector<16x128xf32>
    %22 = arith.addf %19, %21 : vector<16x128xf32>
    %c0_17 = arith.constant 0 : index
    %c0_18 = arith.constant 0 : index
    %23 = vector.load %arg8[%c0_17, %c0_18] : memref<16x128xf32, #tpu.memory_space<vmem>>, vector<16x128xf32>
    tpu.vector_store %arg8[%c0_17, %c0_18], %22 {strides = array<i32>} : memref<16x128xf32, #tpu.memory_space<vmem>>, vector<16x128xf32>,
    return
  }
  func.func @transform_0(%arg0: i32) -> (i32, i32) {
    %c0_i32 = arith.constant 0 : i32
    %c0_i32_0 = arith.constant 0 : i32
    return %arg0, %c0_i32 : i32, i32
  }
  func.func @transform_1(%arg0: i32) -> (i32, i32) {
    %c0_i32 = arith.constant 0 : i32
    %c0_i32_0 = arith.constant 0 : i32
    %c0_i32_1 = arith.constant 0 : i32
    return %c0_i32, %c0_i32_0 : i32, i32
  }
  func.func @transform_2(%arg0: i32) -> (i32, i32) {
    %c0_i32 = arith.constant 0 : i32
    %c0_i32_0 = arith.constant 0 : i32
    %c0_i32_1 = arith.constant 0 : i32
    return %c0_i32, %c0_i32_0 : i32, i32
  }
  func.func @transform_3(%arg0: i32) -> (i32, i32) {
    %c0_i32 = arith.constant 0 : i32
    %c0_i32_0 = arith.constant 0 : i32
    %c0_i32_1 = arith.constant 0 : i32
    return %c0_i32, %c0_i32_0 : i32, i32
  }
  func.func @transform_4(%arg0: i32) -> (i32, i32) {
    %c0_i32 = arith.constant 0 : i32
    %c0_i32_0 = arith.constant 0 : i32
    %c0_i32_1 = arith.constant 0 : i32
    return %c0_i32, %c0_i32_0 : i32, i32
  }
  func.func @transform_5(%arg0: i32) -> (i32, i32) {
    %c0_i32 = arith.constant 0 : i32
    %c0_i32_0 = arith.constant 0 : i32
    %c0_i32_1 = arith.constant 0 : i32
    return %c0_i32, %c0_i32_0 : i32, i32
  }
  func.func @transform_6(%arg0: i32) -> (i32, i32) {
    %c0_i32 = arith.constant 0 : i32
    %c0_i32_0 = arith.constant 0 : i32
    %c0_i32_1 = arith.constant 0 : i32
    return %c0_i32, %c0_i32_0 : i32, i32
  }
  func.func @transform_7(%arg0: i32) -> (i32, i32) {
    %c0_i32 = arith.constant 0 : i32
    %c0_i32_0 = arith.constant 0 : i32
    return %arg0, %c0_i32 : i32, i32
  }
}

module attributes {stable_mosaic.version = 11 : i64} {
  func.func @mlp_kernel(%arg0: i32, %arg1: memref<16x32xf32, #tpu.memory_space<vmem>>, %arg2: memref<32x32xbf16, #tpu.memory_space<vmem>>, %arg3: memref<1x32xf32, #tpu.memory_space<vmem>>, %arg4: memref<32x32xbf16, #tpu.memory_space<vmem>>, %arg5: memref<1x32xf32, #tpu.memory_space<vmem>>, %arg6: memref<32x128xbf16, #tpu.memory_space<vmem>>, %arg7: memref<1x128xf32, #tpu.memory_space<vmem>>, %arg8: memref<16x128xf32, #tpu.memory_space<vmem>>) attributes {dimension_semantics = [#tpu.dimension_semantics<parallel>], iteration_bounds = array<i64: 1>, scalar_prefetch = 0 : i64, scratch_operands = 0 : i64, tpu.core_type = #tpu.core_type<tc>, window_params = [{transform_indices = @transform_0, window_bounds = array<i64: 16, 32>}, {pipeline_mode = #tpu.pipeline_mode<synchronous>, transform_indices = @transform_1, window_bounds = array<i64: 32, 32>}, {pipeline_mode = #tpu.pipeline_mode<synchronous>, transform_indices = @transform_2, window_bounds = array<i64: 1, 32>}, {pipeline_mode = #tpu.pipeline_mode<synchronous>, transform_indices = @transform_3, window_bounds = array<i64: 32, 32>}, {pipeline_mode = #tpu.pipeline_mode<synchronous>, transform_indices = @transform_4, window_bounds = array<i64: 1, 32>}, {pipeline_mode = #tpu.pipeline_mode<synchronous>, transform_indices = @transform_5, window_bounds = array<i64: 32, 128>}, {pipeline_mode = #tpu.pipeline_mode<synchronous>, transform_indices = @transform_6, window_bounds = array<i64: 1, 128>}, {transform_indices = @transform_7, window_bounds = array<i64: 16, 128>}]} {
    %c0 = arith.constant 0 : index
    %c0_0 = arith.constant 0 : index
    %0 = vector.load %arg1[%c0, %c0_0] : memref<16x32xf32, #tpu.memory_space<vmem>>, vector<16x32xf32>
    %1 = arith.truncf %0 : vector<16x32xf32> to vector<16x32xbf16>
    %c0_1 = arith.constant 0 : index
    %c0_2 = arith.constant 0 : index
    %2 = vector.load %arg2[%c0_1, %c0_2] : memref<32x32xbf16, #tpu.memory_space<vmem>>, vector<32x32xbf16>
    %cst = arith.constant dense<0.000000e+00> : vector<16x32xf32>
    %3 = tpu.matmul %1, %2, %cst {dimension_numbers = #tpu.dot_dimension_numbers<[1], [0], [0], [1], [0, 0, 1, 1], [], []>} : vector<16x32xbf16>, vector<32x32xbf16>, vector<16x32xf32> -> vector<16x32xf32>
    %c0_3 = arith.constant 0 : index
    %c0_4 = arith.constant 0 : index
    %4 = vector.load %arg3[%c0_3, %c0_4] : memref<1x32xf32, #tpu.memory_space<vmem>>, vector<1x32xf32>
    %5 = vector.broadcast %4 : vector<1x32xf32> to vector<16x32xf32>
    %6 = arith.addf %3, %5 : vector<16x32xf32>
    %cst_5 = arith.constant 0.000000e+00 : f32
    %7 = vector.broadcast %cst_5 : f32 to vector<16x32xf32>
    %8 = arith.maximumf %6, %7 : vector<16x32xf32>
    %9 = arith.truncf %8 : vector<16x32xf32> to vector<16x32xbf16>
    %c0_6 = arith.constant 0 : index
    %c0_7 = arith.constant 0 : index
    %10 = vector.load %arg4[%c0_6, %c0_7] : memref<32x32xbf16, #tpu.memory_space<vmem>>, vector<32x32xbf16>
    %cst_8 = arith.constant dense<0.000000e+00> : vector<16x32xf32>
    %11 = tpu.matmul %9, %10, %cst_8 {dimension_numbers = #tpu.dot_dimension_numbers<[1], [0], [0], [1], [0, 0, 1, 1], [], []>} : vector<16x32xbf16>, vector<32x32xbf16>, vector<16x32xf32> -> vector<16x32xf32>
    %c0_9 = arith.constant 0 : index
    %c0_10 = arith.constant 0 : index
    %12 = vector.load %arg5[%c0_9, %c0_10] : memref<1x32xf32, #tpu.memory_space<vmem>>, vector<1x32xf32>
    %13 = vector.broadcast %12 : vector<1x32xf32> to vector<16x32xf32>
    %14 = arith.addf %11, %13 : vector<16x32xf32>
    %cst_11 = arith.constant 0.000000e+00 : f32
    %15 = vector.broadcast %cst_11 : f32 to vector<16x32xf32>
    %16 = arith.maximumf %14, %15 : vector<16x32xf32>
    %17 = arith.truncf %16 : vector<16x32xf32> to vector<16x32xbf16>
    %c0_12 = arith.constant 0 : index
    %c0_13 = arith.constant 0 : index
    %18 = vector.load %arg6[%c0_12, %c0_13] : memref<32x128xbf16, #tpu.memory_space<vmem>>, vector<32x128xbf16>
    %cst_14 = arith.constant dense<0.000000e+00> : vector<16x128xf32>
    %19 = tpu.matmul %17, %18, %cst_14 {dimension_numbers = #tpu.dot_dimension_numbers<[1], [0], [0], [1], [0, 0, 1, 1], [], []>} : vector<16x32xbf16>, vector<32x128xbf16>, vector<16x128xf32> -> vector<16x128xf32>
    %c0_15 = arith.constant 0 : index
    %c0_16 = arith.constant 0 : index
    %20 = vector.load %arg7[%c0_15, %c0_16] : memref<1x128xf32, #tpu.memory_space<vmem>>, vector<1x128xf32>
    %21 = vector.broadcast %20 : vector<1x128xf32> to vector<16x128xf32>
    %22 = arith.addf %19, %21 : vector<16x128xf32>
    %c0_17 = arith.constant 0 : index
    %c0_18 = arith.constant 0 : index
    %23 = vector.load %arg8[%c0_17, %c0_18] : memref<16x128xf32, #tpu.memory_space<vmem>>, vector<16x128xf32>
    tpu.vector_store %arg8[%c0_17, %c0_18], %22 {strides = array<i32>} : memref<16x128xf32, #tpu.memory_space<vmem>>, vector<16x128xf32>,
    return
  }
  func.func @transform_0(%arg0: i32) -> (i32, i32) {
    %c0_i32 = arith.constant 0 : i32
    %c0_i32_0 = arith.constant 0 : i32
    return %arg0, %c0_i32 : i32, i32
  }
  func.func @transform_1(%arg0: i32) -> (i32, i32) {
    %c0_i32 = arith.constant 0 : i32
    %c0_i32_0 = arith.constant 0 : i32
    %c0_i32_1 = arith.constant 0 : i32
    return %c0_i32, %c0_i32_0 : i32, i32
  }
  func.func @transform_2(%arg0: i32) -> (i32, i32) {
    %c0_i32 = arith.constant 0 : i32
    %c0_i32_0 = arith.constant 0 : i32
    %c0_i32_1 = arith.constant 0 : i32
    return %c0_i32, %c0_i32_0 : i32, i32
  }
  func.func @transform_3(%arg0: i32) -> (i32, i32) {
    %c0_i32 = arith.constant 0 : i32
    %c0_i32_0 = arith.constant 0 : i32
    %c0_i32_1 = arith.constant 0 : i32
    return %c0_i32, %c0_i32_0 : i32, i32
  }
  func.func @transform_4(%arg0: i32) -> (i32, i32) {
    %c0_i32 = arith.constant 0 : i32
    %c0_i32_0 = arith.constant 0 : i32
    %c0_i32_1 = arith.constant 0 : i32
    return %c0_i32, %c0_i32_0 : i32, i32
  }
  func.func @transform_5(%arg0: i32) -> (i32, i32) {
    %c0_i32 = arith.constant 0 : i32
    %c0_i32_0 = arith.constant 0 : i32
    %c0_i32_1 = arith.constant 0 : i32
    return %c0_i32, %c0_i32_0 : i32, i32
  }
  func.func @transform_6(%arg0: i32) -> (i32, i32) {
    %c0_i32 = arith.constant 0 : i32
    %c0_i32_0 = arith.constant 0 : i32
    %c0_i32_1 = arith.constant 0 : i32
    return %c0_i32, %c0_i32_0 : i32, i32
  }
  func.func @transform_7(%arg0: i32) -> (i32, i32) {
    %c0_i32 = arith.constant 0 : i32
    %c0_i32_0 = arith.constant 0 : i32
    return %arg0, %c0_i32 : i32, i32
  }
}

</mosaic_0001>

<bundles_post_ra>
// kernel: _forward_impl.1
= control target key start
LH: loop header
LB: loop body
LE: loop exit
PB: predicated region body
PF: predicated region fallthrough
CT: control target
= control target key end

     0   :  { %12 = vsyncpa [#allocation3], 0  ;;  %s578_s0 = inlined_call_operand.hbm [shape: f32[16,32], index: 0, kind: input, shape index: {}]   ;;  %s579_s1 = inlined_call_operand.hbm [shape: bf16[32,32], index: 1, kind: input, shape index: {}]   ;;  %s580_s2 = inlined_call_operand.vmem [shape: f32[1,32], index: 2, kind: input, shape index: {}]   ;;  %s581_s3 = inlined_call_operand.hbm [shape: bf16[32,32], index: 3, kind: input, shape index: {}]   ;;  %s582_s4 = inlined_call_operand.vmem [shape: f32[1,32], index: 4, kind: input, shape index: {}]   ;;  %s583_s5 = inlined_call_operand.hbm [shape: bf16[32,128], index: 5, kind: input, shape index: {}]   ;;  %s584_s6 = inlined_call_operand.vmem [shape: f32[1,128], index: 6, kind: input, shape index: {}]   ;;  %s585_s7 = inlined_call_operand.hbm [shape: f32[16,128], index: 7, kind: output, shape index: {}]  }
   0x1   :  { %13 = vsyncpa [#allocation6], 0 }
   0x2   :  { %14 = vsyncpa [#allocation9], 0 }
   0x3   :  { %15 = vsyncpa [#allocation4], 0  ;;  %s485_s24 = smov [#allocation5]  }
   0x4   :  { %s33_s25 = sshll.u32 %s485_s24, 4  ;;  %s34_s25 = int_to_ptr.vmem [resolvable:$true] %s33_s25 }
   0x5   :  { %s385_s26 = scalar_lea.vmem %s34_s25, 256  ;;  %p390_p1 = scmp.lt.s32.totalorder %s34_s25, %s34_s25 }
   0x6   :  { %p386_p0 = scmp.ne.s32.totalorder %s34_s25, %s385_s26  ;;  %p391_p2 = scmp.lt.s32.totalorder %s385_s26, %s385_s26 }
   0x8   :  { %p392_p3 = por %p391_p2, %p390_p1 }
   0xa   :  { %p393_p4 = pnand %p392_p3, %p386_p0 }
   0xc   :  { %396 = shalt.err (!%p393_p4)
}
   0xd   :  { %s486_s27 = smov 64   ;;  %s487_s28 = smov 4  }
   0xe   :  { %39 = dma.hbm_to_vmem [thread:$0]  %s579_s1, 256, %s34_s25, [#allocation6], %s486_s27, %s486_s27, %s487_s28  }
   0xf   :  { %s488_s8 = smov [#allocation2]  }
  0x10   :  { %s21_s9 = sshll.u32 %s488_s8, 4  ;;  %s22_s9 = int_to_ptr.vmem [resolvable:$true] %s21_s9 }
  0x11   :  { %s405_s10 = scalar_lea.vmem %s22_s9, 256  ;;  %p410_p6 = scmp.lt.s32.totalorder %s22_s9, %s22_s9 }
  0x12   :  { %p406_p5 = scmp.ne.s32.totalorder %s22_s9, %s405_s10  ;;  %p411_p7 = scmp.lt.s32.totalorder %s405_s10, %s405_s10 }
  0x14   :  { %p412_p8 = por %p411_p7, %p410_p6 }
  0x16   :  { %p413_p9 = pnand %p412_p8, %p406_p5 }
  0x18   :  { %416 = shalt.err (!%p413_p9)
}
  0x19   :  { %s489_s11 = smov 128   ;;  %s490_s12 = smov 8  }
  0x1a   :  { %27 = dma.hbm_to_vmem [thread:$0]  %s578_s0, 256, %s22_s9, [#allocation3], %s489_s11, %s489_s11, %s490_s12  }
  0x1b   :  { %s491_s1 = smov [#allocation7]   ;;  %s492_s16 = smov [#allocation8]  }
  0x1c   :  { %s47_s15 = sshll.u32 %s491_s1, 4  ;;  %s61_s17 = sshll.u32 %s492_s16, 4  ;;  %s48_s15 = int_to_ptr.vmem [resolvable:$true] %s47_s15  ;;  %s62_s17 = int_to_ptr.vmem [resolvable:$true] %s61_s17 }
  0x1d   :  { %s425_s18 = scalar_lea.vmem %s48_s15, 256  ;;  %p430_p11 = scmp.lt.s32.totalorder %s48_s15, %s48_s15 }
  0x1e   :  { %p426_p10 = scmp.ne.s32.totalorder %s48_s15, %s425_s18  ;;  %p431_p12 = scmp.lt.s32.totalorder %s425_s18, %s425_s18 }
  0x20   :  { %p432_p13 = por %p431_p12, %p430_p11 }
  0x22   :  { %p433_p0 = pnand %p432_p13, %p426_p10 }
  0x24   :  { %436 = shalt.err (!%p433_p0)
}
  0x25   :  { %53 = dma.hbm_to_vmem [thread:$0]  %s581_s3, 256, %s48_s15, [#allocation6], %s486_s27, %s486_s27, %s487_s28  }
  0x26   :  { %s445_s0 = scalar_lea.vmem %s62_s17, 256  ;;  %p450_p2 = scmp.lt.s32.totalorder %s62_s17, %s62_s17 }
  0x27   :  { %p446_p1 = scmp.ne.s32.totalorder %s62_s17, %s445_s0  ;;  %p451_p3 = scmp.lt.s32.totalorder %s445_s0, %s445_s0 }
  0x29   :  { %p452_p4 = por %p451_p3, %p450_p2 }
  0x2b   :  { %p453_p5 = pnand %p452_p4, %p446_p1 }
  0x2d   :  { %456 = shalt.err (!%p453_p5)
}
  0x2e   :  { %67 = dma.hbm_to_vmem [thread:$0]  %s583_s5, 256, %s62_s17, [#allocation9], %s486_s27, %s486_s27, %s487_s28  }
  0x2f   :  { %477 = dma.done.wait [#allocation3], 256  }
  0x30   :  { %478 = vsyncadd [#allocation3], 4294967040 }
  0x31   :  { %479 = dma.done.wait [#allocation6], 512  }
  0x32   :  { %480 = vsyncadd [#allocation6], 4294966784 }
  0x33   :  { %481 = dma.done.wait [#allocation9], 256  }
  0x34   :  { %482 = vsyncadd [#allocation9], 4294967040  ;;  %v493_v0 = vmov 0.0   ;;  %vm494_vm0 = vmmov 0   ;;  %v371_v1 = vld [vmem:[#allocation5 + $0x8] sm:$0xff]   ;;  %v372_v2 = vld [vmem:[#allocation5] sm:$0xff]  }
  0x35   :  { %336 = vmatprep.subr.bf16.mxu0 %v493_v0  ;;  %340 = vmatprep.mubr.msk.bf16.mxu0 %vm494_vm0, %v493_v0  ;;  %v83_v3 = vld [vmem:[#allocation2] sm:$0xff]  ;;  %v84_v4 = vld [vmem:[#allocation2 + $0x8] sm:$0xff]  ;;  %vm109_vm1 = vcmask 261120   ;;  %v375_v18 = vld [vmem:[#allocation8 + $0x8] sm:$0xff]   ;;  %s495_s26 = smov [#allocation10]  }
  0x36   :  { %344 = vmatprep.subr.bf16.mxu1 %v493_v0  ;;  %348 = vmatprep.mubr.msk.bf16.mxu1 %vm494_vm0, %v493_v0  ;;  %v85_v5 = vpack.c.bf16 %v84_v4, %v83_v3  ;;  %v373_v6 = vld [vmem:[#allocation7 + $0x8] sm:$0xff]   ;;  %v374_v7 = vld [vmem:[#allocation7] sm:$0xff]   ;;  %v376_v19 = vld [vmem:[#allocation8] sm:$0xff]  }
  0x37   :  { %337 = vmatpush3.bf16.msra.mxu0 %v371_v1  ;;  %345 = vmatpush3.bf16.msra.mxu1 %v373_v6  ;;  %v315_v8 = vld [vmem:[%s580_s2] ss:$0 sm:$0xff] }
  0x38   :  { %338 = vmatprep.subr.bf16.mxu0 %v493_v0  ;;  %346 = vmatprep.subr.bf16.mxu1 %v493_v0  ;;  %v319_v20 = vld [vmem:[%s582_s4] ss:$0 sm:$0xff]  ;;  %s301_s4 = sshll.u32 %s495_s26, 4  ;;  %s302_s4 = int_to_ptr.vmem [resolvable:$true] %s301_s4 }
  0x39   :  { %v323_v30 = vld [vmem:[%s584_s6] ss:$0 sm:$0xff]  ;;  %s457_s27 = scalar_lea.vmem %s302_s4, 256  ;;  %p462_p7 = scmp.lt.s32.totalorder %s302_s4, %s302_s4 }
  0x3a   :  { %p458_p6 = scmp.ne.s32.totalorder %s302_s4, %s457_s27  ;;  %p463_p8 = scmp.lt.s32.totalorder %s457_s27, %s457_s27 }
  0x3b   :  { %339 = vmatpush3.bf16.msra.mxu0 %v372_v2  ;;  %347 = vmatpush3.bf16.msra.mxu1 %v374_v7 }
  0x3c   :  { %352 = vmatprep.subr.bf16.mxu0 %v493_v0  ;;  %p464_p9 = por %p463_p8, %p462_p7 }
  0x3e   :  { %341 = vmatmul.mubr.msk.bf16.vlgmr.msra.gmra.mxu0 %vm109_vm1, %v85_v5  ;;  %p465_p10 = pnand %p464_p9, %p458_p6 }
  0x3f   :  { %356 = vmatprep.mubr.msk.bf16.mxu0 %vm494_vm0, %v493_v0  ;;  %353 = vmatpush3.bf16.msra.mxu0 %v375_v18 }
  0x40   :  { %354 = vmatprep.subr.bf16.mxu0 %v493_v0 }
  0x43   :  { %355 = vmatpush3.bf16.msra.mxu0 %v376_v19 }
  0xfe   :  { %v147_v9 = vpop.f32.mrf.mxu0 }
  0xff   :  { %v148_v11 = vadd.f32 %v315_v8, %v147_v9 }
 0x100   :  { %v342_v10 = vpop.f32.mrf.mxu0 }
 0x101   :  { %v154_v15 = vmax.f32 %v148_v11, 0.0 }
 0x102   :  { %v150_v12 = vpop.f32.mrf.mxu0 }
 0x103   :  { %v151_v13 = vadd.f32 %v315_v8, %v150_v12 }
 0x104   :  { %v343_v14 = vpop.f32.mrf.mxu0 }
 0x105   :  { %v155_v16 = vmax.f32 %v151_v13, 0.0 }
 0x107   :  { %v156_v17 = vpack.c.bf16 %v155_v16, %v154_v15 }
 0x109   :  { %349 = vmatmul.mubr.msk.bf16.vlgmr.msra.gmra.mxu1 %vm109_vm1, %v156_v17 }
 0x1c9   :  { %v217_v21 = vpop.f32.mrf.mxu1 }
 0x1ca   :  { %v218_v23 = vadd.f32 %v319_v20, %v217_v21 }
 0x1cb   :  { %v350_v22 = vpop.f32.mrf.mxu1 }
 0x1cc   :  { %v224_v27 = vmax.f32 %v218_v23, 0.0 }
 0x1cd   :  { %v220_v24 = vpop.f32.mrf.mxu1 }
 0x1ce   :  { %v221_v25 = vadd.f32 %v319_v20, %v220_v24 }
 0x1cf   :  { %v351_v26 = vpop.f32.mrf.mxu1 }
 0x1d0   :  { %v225_v28 = vmax.f32 %v221_v25, 0.0 }
 0x1d2   :  { %v226_v29 = vpack.c.bf16 %v225_v28, %v224_v27 }
 0x1d4   :  { %357 = vmatmul.mubr.msk.bf16.vlgmr.msra.gmra.mxu0 %vm109_vm1, %v226_v29 }
 0x294   :  { %v287_v31 = vpop.f32.mrf.mxu0 }
 0x295   :  { %v288_v32 = vadd.f32 %v323_v30, %v287_v31 }
 0x296   :  { %v358_v33 = vpop.f32.mrf.mxu0 }
 0x297   :  { %294 = vst [vmem:[#allocation10] sm:$0xff] %v288_v32 }
 0x298   :  { %v290_v34 = vpop.f32.mrf.mxu0 }
 0x299   :  { %v291_v35 = vadd.f32 %v323_v30, %v290_v34 }
 0x29a   :  { %v359_v36 = vpop.f32.mrf.mxu0 }
 0x29b   :  { %295 = vst [vmem:[#allocation10 + $0x8] sm:$0xff] %v291_v35 }
 0x29c   :  { %468 = shalt.err (!%p465_p10)
}
 0x29d   :  { %307 = dma.vmem_to_hbm [thread:$0]  %s302_s4, 256, %s585_s7, [#allocation4], %s489_s11, %s489_s11, %s490_s12  }
 0x29e   :  { %483 = dma.done.wait [#allocation4], 256  }
 0x29f   :  { %484 = vsyncadd [#allocation4], 4294967040 }
 0x2a0   :  { %311 = vsyncpa [#allocation3], 1 }
 0x2a1   :  { %312 = vsyncpa [#allocation6], 1 }
 0x2a2   :  { %313 = vsyncpa [#allocation9], 1 }
 0x2a3   :  { %314 = vsyncpa [#allocation4], 1 }

// kernel: _forward_impl.1
= control target key start
LH: loop header
LB: loop body
LE: loop exit
PB: predicated region body
PF: predicated region fallthrough
CT: control target
= control target key end

     0   :  { %12 = vsyncpa [#allocation3], 0  ;;  %s578_s0 = inlined_call_operand.hbm [shape: f32[16,32], index: 0, kind: input, shape index: {}]   ;;  %s579_s1 = inlined_call_operand.hbm [shape: bf16[32,32], index: 1, kind: input, shape index: {}]   ;;  %s580_s2 = inlined_call_operand.vmem [shape: f32[1,32], index: 2, kind: input, shape index: {}]   ;;  %s581_s3 = inlined_call_operand.hbm [shape: bf16[32,32], index: 3, kind: input, shape index: {}]   ;;  %s582_s4 = inlined_call_operand.vmem [shape: f32[1,32], index: 4, kind: input, shape index: {}]   ;;  %s583_s5 = inlined_call_operand.hbm [shape: bf16[32,128], index: 5, kind: input, shape index: {}]   ;;  %s584_s6 = inlined_call_operand.vmem [shape: f32[1,128], index: 6, kind: input, shape index: {}]   ;;  %s585_s7 = inlined_call_operand.hbm [shape: f32[16,128], index: 7, kind: output, shape index: {}]  }
   0x1   :  { %13 = vsyncpa [#allocation6], 0 }
   0x2   :  { %14 = vsyncpa [#allocation9], 0 }
   0x3   :  { %15 = vsyncpa [#allocation4], 0  ;;  %s485_s24 = smov [#allocation5]  }
   0x4   :  { %s33_s25 = sshll.u32 %s485_s24, 4  ;;  %s34_s25 = int_to_ptr.vmem [resolvable:$true] %s33_s25 }
   0x5   :  { %s385_s26 = scalar_lea.vmem %s34_s25, 256  ;;  %p390_p1 = scmp.lt.s32.totalorder %s34_s25, %s34_s25 }
   0x6   :  { %p386_p0 = scmp.ne.s32.totalorder %s34_s25, %s385_s26  ;;  %p391_p2 = scmp.lt.s32.totalorder %s385_s26, %s385_s26 }
   0x8   :  { %p392_p3 = por %p391_p2, %p390_p1 }
   0xa   :  { %p393_p4 = pnand %p392_p3, %p386_p0 }
   0xc   :  { %396 = shalt.err (!%p393_p4)
}
   0xd   :  { %s486_s27 = smov 64   ;;  %s487_s28 = smov 4  }
   0xe   :  { %39 = dma.hbm_to_vmem [thread:$0]  %s579_s1, 256, %s34_s25, [#allocation6], %s486_s27, %s486_s27, %s487_s28  }
   0xf   :  { %s488_s8 = smov [#allocation2]  }
  0x10   :  { %s21_s9 = sshll.u32 %s488_s8, 4  ;;  %s22_s9 = int_to_ptr.vmem [resolvable:$true] %s21_s9 }
  0x11   :  { %s405_s10 = scalar_lea.vmem %s22_s9, 256  ;;  %p410_p6 = scmp.lt.s32.totalorder %s22_s9, %s22_s9 }
  0x12   :  { %p406_p5 = scmp.ne.s32.totalorder %s22_s9, %s405_s10  ;;  %p411_p7 = scmp.lt.s32.totalorder %s405_s10, %s405_s10 }
  0x14   :  { %p412_p8 = por %p411_p7, %p410_p6 }
  0x16   :  { %p413_p9 = pnand %p412_p8, %p406_p5 }
  0x18   :  { %416 = shalt.err (!%p413_p9)
}
  0x19   :  { %s489_s11 = smov 128   ;;  %s490_s12 = smov 8  }
  0x1a   :  { %27 = dma.hbm_to_vmem [thread:$0]  %s578_s0, 256, %s22_s9, [#allocation3], %s489_s11, %s489_s11, %s490_s12  }
  0x1b   :  { %s491_s1 = smov [#allocation7]   ;;  %s492_s16 = smov [#allocation8]  }
  0x1c   :  { %s47_s15 = sshll.u32 %s491_s1, 4  ;;  %s61_s17 = sshll.u32 %s492_s16, 4  ;;  %s48_s15 = int_to_ptr.vmem [resolvable:$true] %s47_s15  ;;  %s62_s17 = int_to_ptr.vmem [resolvable:$true] %s61_s17 }
  0x1d   :  { %s425_s18 = scalar_lea.vmem %s48_s15, 256  ;;  %p430_p11 = scmp.lt.s32.totalorder %s48_s15, %s48_s15 }
  0x1e   :  { %p426_p10 = scmp.ne.s32.totalorder %s48_s15, %s425_s18  ;;  %p431_p12 = scmp.lt.s32.totalorder %s425_s18, %s425_s18 }
  0x20   :  { %p432_p13 = por %p431_p12, %p430_p11 }
  0x22   :  { %p433_p0 = pnand %p432_p13, %p426_p10 }
  0x24   :  { %436 = shalt.err (!%p433_p0)
}
  0x25   :  { %53 = dma.hbm_to_vmem [thread:$0]  %s581_s3, 256, %s48_s15, [#allocation6], %s486_s27, %s486_s27, %s487_s28  }
  0x26   :  { %s445_s0 = scalar_lea.vmem %s62_s17, 256  ;;  %p450_p2 = scmp.lt.s32.totalorder %s62_s17, %s62_s17 }
  0x27   :  { %p446_p1 = scmp.ne.s32.totalorder %s62_s17, %s445_s0  ;;  %p451_p3 = scmp.lt.s32.totalorder %s445_s0, %s445_s0 }
  0x29   :  { %p452_p4 = por %p451_p3, %p450_p2 }
  0x2b   :  { %p453_p5 = pnand %p452_p4, %p446_p1 }
  0x2d   :  { %456 = shalt.err (!%p453_p5)
}
  0x2e   :  { %67 = dma.hbm_to_vmem [thread:$0]  %s583_s5, 256, %s62_s17, [#allocation9], %s486_s27, %s486_s27, %s487_s28  }
  0x2f   :  { %477 = dma.done.wait [#allocation3], 256  }
  0x30   :  { %478 = vsyncadd [#allocation3], 4294967040 }
  0x31   :  { %479 = dma.done.wait [#allocation6], 512  }
  0x32   :  { %480 = vsyncadd [#allocation6], 4294966784 }
  0x33   :  { %481 = dma.done.wait [#allocation9], 256  }
  0x34   :  { %482 = vsyncadd [#allocation9], 4294967040  ;;  %v493_v0 = vmov 0.0   ;;  %vm494_vm0 = vmmov 0   ;;  %v371_v1 = vld [vmem:[#allocation5 + $0x8] sm:$0xff]   ;;  %v372_v2 = vld [vmem:[#allocation5] sm:$0xff]  }
  0x35   :  { %336 = vmatprep.subr.bf16.mxu0 %v493_v0  ;;  %340 = vmatprep.mubr.msk.bf16.mxu0 %vm494_vm0, %v493_v0  ;;  %v83_v3 = vld [vmem:[#allocation2] sm:$0xff]  ;;  %v84_v4 = vld [vmem:[#allocation2 + $0x8] sm:$0xff]  ;;  %vm109_vm1 = vcmask 261120   ;;  %v375_v18 = vld [vmem:[#allocation8 + $0x8] sm:$0xff]   ;;  %s495_s26 = smov [#allocation10]  }
  0x36   :  { %344 = vmatprep.subr.bf16.mxu1 %v493_v0  ;;  %348 = vmatprep.mubr.msk.bf16.mxu1 %vm494_vm0, %v493_v0  ;;  %v85_v5 = vpack.c.bf16 %v84_v4, %v83_v3  ;;  %v373_v6 = vld [vmem:[#allocation7 + $0x8] sm:$0xff]   ;;  %v374_v7 = vld [vmem:[#allocation7] sm:$0xff]   ;;  %v376_v19 = vld [vmem:[#allocation8] sm:$0xff]  }
  0x37   :  { %337 = vmatpush3.bf16.msra.mxu0 %v371_v1  ;;  %345 = vmatpush3.bf16.msra.mxu1 %v373_v6  ;;  %v315_v8 = vld [vmem:[%s580_s2] ss:$0 sm:$0xff] }
  0x38   :  { %338 = vmatprep.subr.bf16.mxu0 %v493_v0  ;;  %346 = vmatprep.subr.bf16.mxu1 %v493_v0  ;;  %v319_v20 = vld [vmem:[%s582_s4] ss:$0 sm:$0xff]  ;;  %s301_s4 = sshll.u32 %s495_s26, 4  ;;  %s302_s4 = int_to_ptr.vmem [resolvable:$true] %s301_s4 }
  0x39   :  { %v323_v30 = vld [vmem:[%s584_s6] ss:$0 sm:$0xff]  ;;  %s457_s27 = scalar_lea.vmem %s302_s4, 256  ;;  %p462_p7 = scmp.lt.s32.totalorder %s302_s4, %s302_s4 }
  0x3a   :  { %p458_p6 = scmp.ne.s32.totalorder %s302_s4, %s457_s27  ;;  %p463_p8 = scmp.lt.s32.totalorder %s457_s27, %s457_s27 }
  0x3b   :  { %339 = vmatpush3.bf16.msra.mxu0 %v372_v2  ;;  %347 = vmatpush3.bf16.msra.mxu1 %v374_v7 }
  0x3c   :  { %352 = vmatprep.subr.bf16.mxu0 %v493_v0  ;;  %p464_p9 = por %p463_p8, %p462_p7 }
  0x3e   :  { %341 = vmatmul.mubr.msk.bf16.vlgmr.msra.gmra.mxu0 %vm109_vm1, %v85_v5  ;;  %p465_p10 = pnand %p464_p9, %p458_p6 }
  0x3f   :  { %356 = vmatprep.mubr.msk.bf16.mxu0 %vm494_vm0, %v493_v0  ;;  %353 = vmatpush3.bf16.msra.mxu0 %v375_v18 }
  0x40   :  { %354 = vmatprep.subr.bf16.mxu0 %v493_v0 }
  0x43   :  { %355 = vmatpush3.bf16.msra.mxu0 %v376_v19 }
  0xfe   :  { %v147_v9 = vpop.f32.mrf.mxu0 }
  0xff   :  { %v148_v11 = vadd.f32 %v315_v8, %v147_v9 }
 0x100   :  { %v342_v10 = vpop.f32.mrf.mxu0 }
 0x101   :  { %v154_v15 = vmax.f32 %v148_v11, 0.0 }
 0x102   :  { %v150_v12 = vpop.f32.mrf.mxu0 }
 0x103   :  { %v151_v13 = vadd.f32 %v315_v8, %v150_v12 }
 0x104   :  { %v343_v14 = vpop.f32.mrf.mxu0 }
 0x105   :  { %v155_v16 = vmax.f32 %v151_v13, 0.0 }
 0x107   :  { %v156_v17 = vpack.c.bf16 %v155_v16, %v154_v15 }
 0x109   :  { %349 = vmatmul.mubr.msk.bf16.vlgmr.msra.gmra.mxu1 %vm109_vm1, %v156_v17 }
 0x1c9   :  { %v217_v21 = vpop.f32.mrf.mxu1 }
 0x1ca   :  { %v218_v23 = vadd.f32 %v319_v20, %v217_v21 }
 0x1cb   :  { %v350_v22 = vpop.f32.mrf.mxu1 }
 0x1cc   :  { %v224_v27 = vmax.f32 %v218_v23, 0.0 }
 0x1cd   :  { %v220_v24 = vpop.f32.mrf.mxu1 }
 0x1ce   :  { %v221_v25 = vadd.f32 %v319_v20, %v220_v24 }
 0x1cf   :  { %v351_v26 = vpop.f32.mrf.mxu1 }
 0x1d0   :  { %v225_v28 = vmax.f32 %v221_v25, 0.0 }
 0x1d2   :  { %v226_v29 = vpack.c.bf16 %v225_v28, %v224_v27 }
 0x1d4   :  { %357 = vmatmul.mubr.msk.bf16.vlgmr.msra.gmra.mxu0 %vm109_vm1, %v226_v29 }
 0x294   :  { %v287_v31 = vpop.f32.mrf.mxu0 }
 0x295   :  { %v288_v32 = vadd.f32 %v323_v30, %v287_v31 }
 0x296   :  { %v358_v33 = vpop.f32.mrf.mxu0 }
 0x297   :  { %294 = vst [vmem:[#allocation10] sm:$0xff] %v288_v32 }
 0x298   :  { %v290_v34 = vpop.f32.mrf.mxu0 }
 0x299   :  { %v291_v35 = vadd.f32 %v323_v30, %v290_v34 }
 0x29a   :  { %v359_v36 = vpop.f32.mrf.mxu0 }
 0x29b   :  { %295 = vst [vmem:[#allocation10 + $0x8] sm:$0xff] %v291_v35 }
 0x29c   :  { %468 = shalt.err (!%p465_p10)
}
 0x29d   :  { %307 = dma.vmem_to_hbm [thread:$0]  %s302_s4, 256, %s585_s7, [#allocation4], %s489_s11, %s489_s11, %s490_s12  }
 0x29e   :  { %483 = dma.done.wait [#allocation4], 256  }
 0x29f   :  { %484 = vsyncadd [#allocation4], 4294967040 }
 0x2a0   :  { %311 = vsyncpa [#allocation3], 1 }
 0x2a1   :  { %312 = vsyncpa [#allocation6], 1 }
 0x2a2   :  { %313 = vsyncpa [#allocation9], 1 }
 0x2a3   :  { %314 = vsyncpa [#allocation4], 1 }

</bundles_post_ra>
